<compile_context>
chip_gen: v5e
topology: v5e:2x2
jax: 0.10.0
libtpu: 0.0.40
codegen_flags: <defaults>
</compile_context>

<pallas_src>
import functools

import jax
import jax.numpy as jnp
from jax.experimental import pallas as pl
from jax.experimental.pallas import tpu as pltpu

_EPS = 1e-5  # nn.BatchNorm3d default eps


def _round_up(x, m):
    return ((x + m - 1) // m) * m


# ---------------------------------------------------------------------------
# Fused tiled matmul kernel: out = epilogue((A @ B) * scale + shift [+res][relu])
# ---------------------------------------------------------------------------
def _make_matmul_kernel(has_residual, apply_relu):
    def kernel(a_ref, b_ref, scale_ref, shift_ref, *rest):
        if has_residual:
            res_ref, o_ref, acc_ref = rest
        else:
            o_ref, acc_ref = rest
        k = pl.program_id(2)

        @pl.when(k == 0)
        def _():
            acc_ref[...] = jnp.zeros_like(acc_ref)

        acc_ref[...] += jnp.dot(a_ref[...], b_ref[...],
                                preferred_element_type=jnp.float32)

        @pl.when(k == pl.num_programs(2) - 1)
        def _():
            y = acc_ref[...] * scale_ref[...] + shift_ref[...]
            if has_residual:
                y = y + res_ref[...].astype(jnp.float32)
            if apply_relu:
                y = jnp.maximum(y, 0.0)
            o_ref[...] = y.astype(o_ref.dtype)

    return kernel


def matmul_affine(a, b, scale, shift, residual=None, relu=False,
                  out_dtype=jnp.bfloat16):
    """epilogue((a @ b) * scale + shift [+ residual]) with f32 MXU accumulation.

    a: (M, K), b: (K, N), scale/shift: (N,), residual: (M, N) or None.
    Operands go to the MXU in bf16; dims are padded so tiles are (8,128)
    aligned and the output store is lane-dense.
    """
    M, K = a.shape
    K2, N = b.shape
    assert K == K2

    tm = 256 if M >= 256 else _round_up(M, 16)
    tn = 128
    tk = 256 if K >= 256 else _round_up(K, 128)
    Mp, Np, Kp = _round_up(M, tm), _round_up(N, tn), _round_up(K, tk)

    a_p = jnp.pad(a.astype(jnp.bfloat16), ((0, Mp - M), (0, Kp - K)))
    b_p = jnp.pad(b.astype(jnp.bfloat16), ((0, Kp - K), (0, Np - N)))
    scale_p = jnp.pad(scale.astype(jnp.float32), (0, Np - N)).reshape(1, Np)
    shift_p = jnp.pad(shift.astype(jnp.float32), (0, Np - N)).reshape(1, Np)

    inputs = [a_p, b_p, scale_p, shift_p]
    in_specs = [
        pl.BlockSpec((tm, tk), lambda i, j, k: (i, k)),
        pl.BlockSpec((tk, tn), lambda i, j, k: (k, j)),
        pl.BlockSpec((1, tn), lambda i, j, k: (0, j)),
        pl.BlockSpec((1, tn), lambda i, j, k: (0, j)),
    ]
    out_itemsize = jnp.dtype(out_dtype).itemsize
    bytes_accessed = (a_p.size * 2 + b_p.size * 2 + Mp * Np * out_itemsize
                      + 2 * Np * 4)
    if residual is not None:
        r_p = jnp.pad(residual.astype(jnp.bfloat16), ((0, Mp - M), (0, Np - N)))
        inputs.append(r_p)
        in_specs.append(pl.BlockSpec((tm, tn), lambda i, j, k: (i, j)))
        bytes_accessed += r_p.size * 2

    out = pl.pallas_call(
        _make_matmul_kernel(residual is not None, relu),
        out_shape=jax.ShapeDtypeStruct((Mp, Np), out_dtype),
        grid=(Mp // tm, Np // tn, Kp // tk),
        in_specs=in_specs,
        out_specs=pl.BlockSpec((tm, tn), lambda i, j, k: (i, j)),
        scratch_shapes=[pltpu.VMEM((tm, tn), jnp.float32)],
        compiler_params=pltpu.CompilerParams(
            dimension_semantics=("parallel", "parallel", "arbitrary")),
        cost_estimate=pl.CostEstimate(
            flops=2 * Mp * Kp * Np, transcendentals=0,
            bytes_accessed=int(bytes_accessed)),
    )(*inputs)
    return out[:M, :N]


# ---------------------------------------------------------------------------
# Element-wise max-of-3 kernel (used by separable max-pool)
# ---------------------------------------------------------------------------
def _max3_kernel(a_ref, b_ref, c_ref, o_ref):
    o_ref[...] = jnp.maximum(jnp.maximum(a_ref[...], b_ref[...]), c_ref[...])


def _pallas_max3(a, b, c):
    """Element-wise maximum of three equally-shaped arrays (lane-dense tiling)."""
    shape, dtype = a.shape, a.dtype
    T = a.size
    LANE = 128
    rows = _round_up(-(-T // LANE), 16)
    tr = 512 if rows >= 512 else rows
    rows = _round_up(rows, tr)
    Tp = rows * LANE

    def prep(v):
        v = v.reshape(-1)
        v = jnp.pad(v, (0, Tp - T))
        return v.reshape(rows, LANE)

    out = pl.pallas_call(
        _max3_kernel,
        out_shape=jax.ShapeDtypeStruct((rows, LANE), dtype),
        grid=(rows // tr,),
        in_specs=[pl.BlockSpec((tr, LANE), lambda i: (i, 0))] * 3,
        out_specs=pl.BlockSpec((tr, LANE), lambda i: (i, 0)),
        compiler_params=pltpu.CompilerParams(
            dimension_semantics=("parallel",)),
    )(prep(a), prep(b), prep(c))
    return out.reshape(-1)[:T].reshape(shape)


# ---------------------------------------------------------------------------
# Global average pool (tiled reduction, output-resident accumulator)
# ---------------------------------------------------------------------------
def _avgpool_kernel(x_ref, o_ref, *, inv_s):
    s = pl.program_id(0)

    @pl.when(s == 0)
    def _():
        o_ref[...] = jnp.zeros_like(o_ref)

    o_ref[...] += jnp.sum(x_ref[...].astype(jnp.float32), axis=1)

    @pl.when(s == pl.num_programs(0) - 1)
    def _():
        o_ref[...] = o_ref[...] * jnp.float32(inv_s)


def global_avg_pool(x):
    """AdaptiveAvgPool3d(1) + squeeze -> (N, C), f32."""
    N, D, H, W, C = x.shape
    S = D * H * W
    x2 = x.reshape(N, S, C)
    Sp = _round_up(S, 16)
    ts = 512 if Sp >= 512 else Sp
    Sp = _round_up(Sp, ts)
    x2 = jnp.pad(x2, ((0, 0), (0, Sp - S), (0, 0)))
    return pl.pallas_call(
        functools.partial(_avgpool_kernel, inv_s=1.0 / S),
        out_shape=jax.ShapeDtypeStruct((N, C), jnp.float32),
        grid=(Sp // ts,),
        in_specs=[pl.BlockSpec((N, ts, C), lambda s: (0, s, 0))],
        out_specs=pl.BlockSpec((N, C), lambda s: (0, 0)),
        compiler_params=pltpu.CompilerParams(
            dimension_semantics=("arbitrary",)),
    )(x2)


# ---------------------------------------------------------------------------
# log_softmax (tiny: (batch, classes))
# ---------------------------------------------------------------------------
def _log_softmax_kernel(x_ref, o_ref):
    x = x_ref[...]
    m = jnp.max(x, axis=-1, keepdims=True)
    e = jnp.exp(x - m)
    o_ref[...] = (x - m) - jnp.log(jnp.sum(e, axis=-1, keepdims=True))


def pallas_log_softmax(x):
    M, C = x.shape
    return pl.pallas_call(
        _log_softmax_kernel,
        out_shape=jax.ShapeDtypeStruct((M, C), jnp.float32),
        grid=(1,),
        in_specs=[pl.BlockSpec((M, C), lambda i: (0, 0))],
        out_specs=pl.BlockSpec((M, C), lambda i: (0, 0)),
    )(x.astype(jnp.float32))


# ---------------------------------------------------------------------------
# Layer helpers
# ---------------------------------------------------------------------------
def _bn_scale_shift(bn):
    scale = bn['gamma'] / jnp.sqrt(bn['var'] + _EPS)
    shift = bn['beta'] - bn['mean'] * scale
    return scale, shift


def conv3d_bn_act(x, w, scale, shift, stride, padding, residual=None,
                  relu=True, out_dtype=jnp.bfloat16):
    """Conv3d (no bias) + BatchNorm affine [+ residual] [+ ReLU], fully fused
    into one Pallas matmul. x: (N, D, H, W, Cin) channels-last;
    w: PyTorch layout (Cout, Cin, kd, kh, kw)."""
    N, D, H, W, Cin = x.shape
    Cout, _, kd, kh, kw = w.shape
    s, p = stride, padding
    xp = jnp.pad(x.astype(jnp.bfloat16),
                 ((0, 0), (p, p), (p, p), (p, p), (0, 0)))
    Do = (D + 2 * p - kd) // s + 1
    Ho = (H + 2 * p - kh) // s + 1
    Wo = (W + 2 * p - kw) // s + 1
    # TODO(synk): for large volumes, fold the kd*kh*kw tap loop into the
    # matmul K grid axis with manual shifted-block DMA instead of
    # materializing the im2col matrix in HBM (im2col kept in bf16 here).
    pats = []
    for i in range(kd):
        for j in range(kh):
            for l in range(kw):
                pats.append(xp[:, i:i + (Do - 1) * s + 1:s,
                               j:j + (Ho - 1) * s + 1:s,
                               l:l + (Wo - 1) * s + 1:s, :])
    M = N * Do * Ho * Wo
    a = jnp.stack(pats, axis=-2).reshape(M, kd * kh * kw * Cin)
    bmat = jnp.transpose(w, (2, 3, 4, 1, 0)).reshape(kd * kh * kw * Cin, Cout)
    res2 = None if residual is None else residual.reshape(M, Cout)
    out = matmul_affine(a, bmat, scale, shift, residual=res2, relu=relu,
                        out_dtype=out_dtype)
    return out.reshape(N, Do, Ho, Wo, Cout)


def maxpool3d(x, kernel=3, stride=2, padding=1):
    """Separable 3x3x3 max pool (W, then H, then D), -inf padding."""
    assert kernel == 3

    def pool_axis(v, axis):
        size = v.shape[axis]
        out_size = (size + 2 * padding - kernel) // stride + 1
        pad_cfg = [(0, 0)] * v.ndim
        pad_cfg[axis] = (padding, padding)
        vp = jnp.pad(v, pad_cfg, constant_values=-jnp.inf)
        views = []
        for t in range(kernel):
            sl = [slice(None)] * v.ndim
            sl[axis] = slice(t, t + (out_size - 1) * stride + 1, stride)
            views.append(vp[tuple(sl)])
        return _pallas_max3(*views)

    x = pool_axis(x, 3)   # W
    x = pool_axis(x, 2)   # H
    x = pool_axis(x, 1)   # D
    return x


def linear(x, w, b, relu=False):
    # PyTorch Linear: y = x @ w.T + b ; w: (out_features, in_features)
    ones = jnp.ones((w.shape[0],), jnp.float32)
    return matmul_affine(x, w.T, ones, b, relu=relu, out_dtype=jnp.float32)


# ---------------------------------------------------------------------------
# ResNet-18 (3-D) forward
# ---------------------------------------------------------------------------
def basic_block(x, p):
    stride = p['stride']
    s1, b1 = _bn_scale_shift(p['bn1'])
    s2, b2 = _bn_scale_shift(p['bn2'])
    out = conv3d_bn_act(x, p['conv1_w'], s1, b1, stride=stride, padding=1,
                        relu=True)
    if p['down'] is not None:
        sd, bd = _bn_scale_shift(p['down']['bn'])
        identity = conv3d_bn_act(x, p['down']['conv_w'], sd, bd,
                                 stride=stride, padding=0, relu=False)
    else:
        identity = x
    # conv2 + BN2 + residual add + ReLU fused into a single Pallas call.
    return conv3d_bn_act(out, p['conv2_w'], s2, b2, stride=1, padding=1,
                         residual=identity, relu=True)


def resnet_forward(params, x_ncdhw, mode):
    x = jnp.transpose(x_ncdhw, (0, 2, 3, 4, 1)).astype(jnp.bfloat16)  # -> NDHWC
    s1, b1 = _bn_scale_shift(params['bn1'])
    x = conv3d_bn_act(x, params['conv1_w'], s1, b1, stride=2, padding=3,
                      relu=True)
    x = maxpool3d(x, kernel=3, stride=2, padding=1)
    for layer in params['layers']:
        for blk in layer:
            x = basic_block(x, blk)
    features = global_avg_pool(x)                     # avgpool(x).squeeze()
    # TODO(synk): Dropout layers are identity here (inference/eval semantics).
    features = linear(features, params['latent_w'], params['latent_b'])
    smoothed_features = features
    if mode == 'encoder':
        return smoothed_features, features
    elif mode == 'regressor':
        h = linear(smoothed_features, params['reg1_w'], params['reg1_b'],
                   relu=True)
        out = linear(h, params['reg2_w'], params['reg2_b'])
        return out, features
    elif mode == 'classifier':
        logits = linear(smoothed_features, params['cls_w'], params['cls_b'])
        return pallas_log_softmax(logits), features
    raise ValueError(f"unknown mode: {mode}")


# ---------------------------------------------------------------------------
# Deterministic parameter construction (shapes from the PyTorch __init__)
# ---------------------------------------------------------------------------
def _conv_w(key, cout, cin, k):
    fan_in = cin * k * k * k
    return jax.random.normal(key, (cout, cin, k, k, k), jnp.float32) * (2.0 / fan_in) ** 0.5


def _bn_params(key, c):
    k1, k2, k3, k4 = jax.random.split(key, 4)
    return {
        'gamma': 1.0 + 0.1 * jax.random.normal(k1, (c,), jnp.float32),
        'beta': 0.1 * jax.random.normal(k2, (c,), jnp.float32),
        'mean': 0.1 * jax.random.normal(k3, (c,), jnp.float32),
        'var': 0.5 + jax.random.uniform(k4, (c,), jnp.float32),
    }


def _linear_params(key, cin, cout):
    k1, k2 = jax.random.split(key)
    bound = 1.0 / (cin ** 0.5)
    w = jax.random.uniform(k1, (cout, cin), jnp.float32, -bound, bound)
    b = jax.random.uniform(k2, (cout,), jnp.float32, -bound, bound)
    return w, b


def init_resnet_params(key, input_channels, latent_dim, output_dim):
    keys = iter(jax.random.split(key, 256))
    params = {}
    params['conv1_w'] = _conv_w(next(keys), 16, input_channels, 7)
    params['bn1'] = _bn_params(next(keys), 16)
    layer_cfg = [(16, 2, 1), (32, 2, 2), (64, 2, 2), (128, 2, 2)]  # num_layers=18
    in_ch = 16
    layers = []
    for out_ch, blocks, stride in layer_cfg:
        blks = []
        for bi in range(blocks):
            s = stride if bi == 0 else 1
            blk = {
                'stride': s,
                'conv1_w': _conv_w(next(keys), out_ch, in_ch, 3),
                'bn1': _bn_params(next(keys), out_ch),
                'conv2_w': _conv_w(next(keys), out_ch, out_ch, 3),
                'bn2': _bn_params(next(keys), out_ch),
                'down': None,
            }
            if bi == 0 and stride != 1:
                blk['down'] = {
                    'conv_w': _conv_w(next(keys), out_ch, in_ch, 1),
                    'bn': _bn_params(next(keys), out_ch),
                }
            blks.append(blk)
            in_ch = out_ch
        layers.append(blks)
    params['layers'] = layers
    params['latent_w'], params['latent_b'] = _linear_params(next(keys), 128, latent_dim)
    params['reg1_w'], params['reg1_b'] = _linear_params(next(keys), latent_dim, 64)
    params['reg2_w'], params['reg2_b'] = _linear_params(next(keys), 64, 1)
    params['cls_w'], params['cls_b'] = _linear_params(next(keys), latent_dim, output_dim)
    return params


if __name__ == "__main__":
    key = jax.random.PRNGKey(0)
    pkey, xkey = jax.random.split(key)

    input_channels, latent_dim, output_dim = 2, 32, 16
    params = init_resnet_params(pkey, input_channels, latent_dim, output_dim)

    # NCDHW input, as the PyTorch Conv3d expects.
    x = jax.random.normal(xkey, (2, input_channels, 16, 16, 16), jnp.float32)

    log_probs, features = resnet_forward(params, x, mode='classifier')
    jax.block_until_ready((log_probs, features))

    assert log_probs.shape == (2, output_dim)
    assert features.shape == (2, latent_dim)
    assert bool(jnp.all(jnp.isfinite(log_probs))) and bool(jnp.all(jnp.isfinite(features)))
    print("KERNEL_OK")
</pallas_src>

<mosaic_0001>
module attributes {stable_mosaic.version = 11 : i64} {
  func.func @kernel(%arg0: i32, %arg1: i32, %arg2: i32, %arg3: memref<256x256xbf16, #tpu.memory_space<vmem>>, %arg4: memref<256x128xbf16, #tpu.memory_space<vmem>>, %arg5: memref<1x128xf32, #tpu.memory_space<vmem>>, %arg6: memref<1x128xf32, #tpu.memory_space<vmem>>, %arg7: memref<256x128xbf16, #tpu.memory_space<vmem>>, %arg8: memref<256x128xf32, #tpu.memory_space<vmem>>) attributes {dimension_semantics = [#tpu.dimension_semantics<parallel>, #tpu.dimension_semantics<parallel>, #tpu.dimension_semantics<arbitrary>], iteration_bounds = array<i64: 4, 1, 3>, scalar_prefetch = 0 : i64, scratch_operands = 1 : i64, tpu.core_type = #tpu.core_type<tc>, window_params = [{transform_indices = @transform_0, window_bounds = array<i64: 256, 256>}, {transform_indices = @transform_1, window_bounds = array<i64: 256, 128>}, {transform_indices = @transform_2, window_bounds = array<i64: 1, 128>}, {transform_indices = @transform_3, window_bounds = array<i64: 1, 128>}, {transform_indices = @transform_4, window_bounds = array<i64: 256, 128>}]} {
    %c0_i32 = arith.constant 0 : i32
    %0 = arith.cmpi eq, %arg2, %c0_i32 : i32
    %1 = arith.extui %0 : i1 to i32
    %c0_i32_0 = arith.constant 0 : i32
    %2 = arith.cmpi ne, %1, %c0_i32_0 : i32
    scf.if %2 {
      %cst_9 = arith.constant 0.000000e+00 : f32
      %12 = vector.broadcast %cst_9 : f32 to vector<256x128xf32>
      %c0_10 = arith.constant 0 : index
      %c0_11 = arith.constant 0 : index
      %13 = vector.load %arg8[%c0_10, %c0_11] : memref<256x128xf32, #tpu.memory_space<vmem>>, vector<256x128xf32>
      tpu.vector_store %arg8[%c0_10, %c0_11], %12 {strides = array<i32>} : memref<256x128xf32, #tpu.memory_space<vmem>>, vector<256x128xf32>,
    } else {
    }
    %c0 = arith.constant 0 : index
    %c0_1 = arith.constant 0 : index
    %3 = vector.load %arg8[%c0, %c0_1] : memref<256x128xf32, #tpu.memory_space<vmem>>, vector<256x128xf32>
    %c0_2 = arith.constant 0 : index
    %c0_3 = arith.constant 0 : index
    %4 = vector.load %arg3[%c0_2, %c0_3] : memref<256x256xbf16, #tpu.memory_space<vmem>>, vector<256x256xbf16>
    %c0_4 = arith.constant 0 : index
    %c0_5 = arith.constant 0 : index
    %5 = vector.load %arg4[%c0_4, %c0_5] : memref<256x128xbf16, #tpu.memory_space<vmem>>, vector<256x128xbf16>
    %cst = arith.constant dense<0.000000e+00> : vector<256x128xf32>
    %6 = tpu.matmul %4, %5, %cst {dimension_numbers = #tpu.dot_dimension_numbers<[1], [0], [0], [1], [0, 0, 1, 1], [], []>} : vector<256x256xbf16>, vector<256x128xbf16>, vector<256x128xf32> -> vector<256x128xf32>
    %7 = arith.addf %3, %6 : vector<256x128xf32>
    %c0_6 = arith.constant 0 : index
    %c0_7 = arith.constant 0 : index
    %8 = vector.load %arg8[%c0_6, %c0_7] : memref<256x128xf32, #tpu.memory_space<vmem>>, vector<256x128xf32>
    tpu.vector_store %arg8[%c0_6, %c0_7], %7 {strides = array<i32>} : memref<256x128xf32, #tpu.memory_space<vmem>>, vector<256x128xf32>,
    %c2_i32 = arith.constant 2 : i32
    %9 = arith.cmpi eq, %arg2, %c2_i32 : i32
    %10 = arith.extui %9 : i1 to i32
    %c0_i32_8 = arith.constant 0 : i32
    %11 = arith.cmpi ne, %10, %c0_i32_8 : i32
    scf.if %11 {
      %c0_9 = arith.constant 0 : index
      %c0_10 = arith.constant 0 : index
      %12 = vector.load %arg8[%c0_9, %c0_10] : memref<256x128xf32, #tpu.memory_space<vmem>>, vector<256x128xf32>
      %c0_11 = arith.constant 0 : index
      %c0_12 = arith.constant 0 : index
      %13 = vector.load %arg5[%c0_11, %c0_12] : memref<1x128xf32, #tpu.memory_space<vmem>>, vector<1x128xf32>
      %14 = vector.broadcast %13 : vector<1x128xf32> to vector<256x128xf32>
      %15 = arith.mulf %12, %14 : vector<256x128xf32>
      %c0_13 = arith.constant 0 : index
      %c0_14 = arith.constant 0 : index
      %16 = vector.load %arg6[%c0_13, %c0_14] : memref<1x128xf32, #tpu.memory_space<vmem>>, vector<1x128xf32>
      %17 = vector.broadcast %16 : vector<1x128xf32> to vector<256x128xf32>
      %18 = arith.addf %15, %17 : vector<256x128xf32>
      %cst_15 = arith.constant 0.000000e+00 : f32
      %19 = vector.broadcast %cst_15 : f32 to vector<256x128xf32>
      %20 = arith.maximumf %18, %19 : vector<256x128xf32>
      %21 = arith.truncf %20 : vector<256x128xf32> to vector<256x128xbf16>
      %c0_16 = arith.constant 0 : index
      %c0_17 = arith.constant 0 : index
      %22 = vector.load %arg7[%c0_16, %c0_17] : memref<256x128xbf16, #tpu.memory_space<vmem>>, vector<256x128xbf16>
      tpu.vector_store %arg7[%c0_16, %c0_17], %21 {strides = array<i32>} : memref<256x128xbf16, #tpu.memory_space<vmem>>, vector<256x128xbf16>,
    } else {
    }
    return
  }
  func.func @transform_0(%arg0: i32, %arg1: i32, %arg2: i32) -> (i32, i32) {
    %c0_i32 = arith.constant 0 : i32
    return %arg0, %arg2 : i32, i32
  }
  func.func @transform_1(%arg0: i32, %arg1: i32, %arg2: i32) -> (i32, i32) {
    %c0_i32 = arith.constant 0 : i32
    return %arg2, %arg1 : i32, i32
  }
  func.func @transform_2(%arg0: i32, %arg1: i32, %arg2: i32) -> (i32, i32) {
    %c0_i32 = arith.constant 0 : i32
    %c0_i32_0 = arith.constant 0 : i32
    return %c0_i32, %arg1 : i32, i32
  }
  func.func @transform_3(%arg0: i32, %arg1: i32, %arg2: i32) -> (i32, i32) {
    %c0_i32 = arith.constant 0 : i32
    %c0_i32_0 = arith.constant 0 : i32
    return %c0_i32, %arg1 : i32, i32
  }
  func.func @transform_4(%arg0: i32, %arg1: i32, %arg2: i32) -> (i32, i32) {
    %c0_i32 = arith.constant 0 : i32
    return %arg0, %arg1 : i32, i32
  }
}

</mosaic_0001>

<bundles_post_ra>
// kernel: tpu_custom_call.1
= control target key start
LH: loop header
LB: loop body
LE: loop exit
PB: predicated region body
PF: predicated region fallthrough
CT: control target
= control target key end

     0   :  { %s2623_s0 = inlined_call_operand.hbm [shape: bf16[1024,768], index: 0, kind: input, shape index: {}]   ;;  %s2624_s1 = inlined_call_operand.hbm [shape: bf16[768,128], index: 1, kind: input, shape index: {}]   ;;  %s2625_s2 = inlined_call_operand.hbm [shape: f32[1,128], index: 2, kind: input, shape index: {}]   ;;  %s2626_s3 = inlined_call_operand.hbm [shape: f32[1,128], index: 3, kind: input, shape index: {}]   ;;  %s2627_s4 = inlined_call_operand.hbm [shape: bf16[1024,128], index: 4, kind: output, shape index: {}]  }
   0x1   :  { %2638 = sst [smem:[#allocation28_spill]] %s2623_s0 }
   0x2   :  { %2639 = sst [smem:[#allocation29_spill]] %s2625_s2 }
   0x3   :  { %2640 = sst [smem:[#allocation30_spill]] %s2626_s3 }
   0x4   :  { %2641 = sst [smem:[#allocation31_spill]] %s2627_s4 }
   0x5   :  { %9 = vsyncpa [#allocation4], 0 }
   0x6   :  { %11 = vsyncpa [#allocation4 + $0x1], 0 }
   0x7   :  { %12 = vsyncpa [#allocation7], 0 }
   0x8   :  { %14 = vsyncpa [#allocation7 + $0x1], 0 }
   0x9   :  { %15 = vsyncpa [#allocation10], 0 }
   0xa   :  { %16 = vsyncpa [#allocation5], 0 }
   0xb   :  { %18 = vsyncpa [#allocation5 + $0x1], 0  ;;  %s2181_s15 = smov 0   ;;  %s2183_s16 = smov 0  }
   0xc   :  { %s2185_s17 = smov 0   ;;  %s2187_s18 = smov 0  }
   0xd   :  { %s2189_s19 = smov 0   ;;  %s2191_s20 = smov 0  }
   0xe   :  { %s2193_s21 = smov 0   ;;  %s2195_s22 = smov 0  }
   0xf   :  { %s2197_s23 = smov 0   ;;  %s2199_s24 = smov 0  }
  0x10   :  { %s2201_s25 = smov 0   ;;  %s2203_s26 = smov 0  }
  0x11   :  { %s2205_s27 = smov 0   ;;  %s2207_s28 = smov 0  }
  0x12 LB: > { %2642 = sst [smem:[#allocation17_spill]] %s2092_s15  ;;  %s2248_s29 = sadd.s32 4294967295, %s2144_s28   ;;  %s2144_s28 = sphi %s2207_s28, %s24_s28   ;;  %s2140_s27 = sphi %s2205_s27, %s2677_s27   ;;  %s2136_s26 = sphi %s2203_s26, %s2687_s26   ;;  %s2132_s25 = sphi %s2201_s25, %s2675_s25   ;;  %s2128_s24 = sphi %s2199_s24, %s2686_s24   ;;  %s2124_s23 = sphi %s2197_s23, %s2674_s23   ;;  %s2120_s22 = sphi %s2195_s22, %s2685_s22   ;;  %s2116_s21 = sphi %s2193_s21, %s2684_s21   ;;  %s2112_s20 = sphi %s2191_s20, %s2683_s20   ;;  %s2108_s19 = sphi %s2189_s19, %s2682_s19   ;;  %s2104_s18 = sphi %s2187_s18, %s2681_s18   ;;  %s2100_s17 = sphi %s2185_s17, %s2680_s17   ;;  %s2096_s16 = sphi %s2183_s16, %s2679_s16   ;;  %s2092_s15 = sphi %s2181_s15, %s2678_s15  }
  0x13   : > { %2643 = sst [smem:[#allocation18_spill]] %s2100_s17  ;;  %s1324_s30 = sadd.s32 4294967294, %s2144_s28  }
  0x14   : > { %2644 = sst [smem:[#allocation19_spill]] %s2124_s23  ;;  %p65_p0 = scmp.ne.s32.totalorder %s2120_s22, %s2116_s21 }
  0x15   : > { %2645 = sst [smem:[#allocation20_spill]] %s2132_s25  ;;  %p66_p1 = scmp.eq.s32.totalorder %s2248_s29, 0 }
  0x16   : > { %2646 = sst [smem:[#allocation21_spill]] %s2140_s27  ;;  %p93_p2 = scmp.ne.s32.totalorder %s2108_s19, %s2104_s18 }
  0x17   : > { %p2257_p3 = por %p66_p1, %p65_p0  ;;  %p170_p4 = scmp.ne.s32.totalorder %s2100_s17, %s2096_s16 }
  0x18   : > { %p2265_p5 = por %p93_p2, %p66_p1  ;;  %p171_p6 = scmp.eq.s32.totalorder %s2248_s29, 11 }
  0x19   : > { %p176_p7 = scmp.ne.s32.totalorder %s2096_s16, %s2092_s15  ;;  %p177_p8 = scmp.eq.s32.totalorder %s1324_s30, 11 }
  0x1a   : > { %p2272_p9 = por %p171_p6, %p170_p4  ;;  %p1325_p10 = scmp.ge.s32.totalorder %s2144_s28, 1 }
  0x1b   : > { %p2277_p11 = por %p177_p8, %p176_p7  ;;  %p184_p12 = scmp.lt.s32.totalorder %s2144_s28, 13 }
  0x1c   : > { %s2649_s8 = scalar_select %p2272_p9, 1, 0 }
  0x1d   : > { %s2651_s9 = scalar_select %p2277_p11, 1, 0 }
  0x1e   : > { %2650 = sst [smem:[#allocation22_spill]] %s2649_s8  ;;  %p2285_p13 = pnand %p1325_p10, %p184_p12 }
  0x1f   : > { %2652 = sst [smem:[#allocation23_spill]] %s2651_s9  ;;  %s2146_s14 = smov [#allocation8]  }
  0x20   : > { %s2653_s2 = sld [smem:[#allocation29_spill]]  ;;  %p1718_p0 = pneg %p2285_p13 }
  0x21   : > { %s199_s18 = sshll.u32 %s2146_s14, 4  ;;  %s2655_s3 = sld [smem:[#allocation30_spill]]  ;;  %s200_s18 = int_to_ptr.vmem [resolvable:$true] %s199_s18 }
  0x22   : > { %p1719_p2 = pnand %p1718_p0, %p66_p1  ;;  %s2147_s11 = smov [#allocation9]  }
  0x23   : > { %s212_s5 = sshll.u32 %s2147_s11, 4  ;;  %s43_s14 = sadd.s32 1, %s2140_s27  ;;  %s213_s5 = int_to_ptr.vmem [resolvable:$true] %s212_s5 }
  0x24   : > { %s52_s9 = sadd.s32 1, %s2124_s23  ;;  %p59_p6 = scmp.ne.s32.totalorder %s2124_s23, %s2120_s22 }
  0x25   : > { %p60_p7 = scmp.eq.s32.totalorder %s2144_s28, 0  ;;  %p1738_p0 = scmp.lt.s32.totalorder %s2144_s28, 12 }
  0x26   : > { %s197_s12 = sshll.u32 %s2653_s2, 4  ;;  %s36_s2 = sadd.s32 1, %s2136_s26  ;;  %s198_s12 = int_to_ptr.hbm [resolvable:$true] %s197_s12 }
  0x27   : > { %s210_s10 = sshll.u32 %s2655_s3, 4  ;;  %p37_p4 = scmp.ge.s32.totalorder %s36_s2, 3  ;;  %s211_s10 = int_to_ptr.hbm [resolvable:$true] %s210_s10 }
  0x28   : > { %1721 = dma.hbm_to_vmem [thread:$0]  (!%p1719_p2), %s198_s12, 16, %s200_s18, [#allocation7]  }
  0x29   : > { %1724 = dma.hbm_to_vmem [thread:$0]  (!%p1719_p2), %s211_s10, 16, %s213_s5, [#allocation10]  }
  0x2a   : > { %s2689_s2 = smov (%p37_p4, %s36_s2), 0  ;;  %s2691_s14 = smov (!%p37_p4, %s43_s14), %s2140_s27 }
  0x2b   : > { %2656 = sst [smem:[#allocation24_spill]] %s2689_s2  ;;  %s2307_s12 = ssub.s32 %s2136_s26, %s2689_s2 }
  0x2c   : > { %p2311_p8 = por %p60_p7, %p59_p6  ;;  %p45_p10 = scmp.ge.s32.totalorder %s2691_s14, 4 }
  0x2d   : > { %p78_p12 = scmp.eq.s32.totalorder %s2307_s12, 0  ;;  %s223_s18 = sand.u32 1, %s2124_s23  }
  0x2e   : > { %s2693_s14 = smov (%p45_p10, %s2691_s14), 0  ;;  %s1329_s21 = sshll.u32 %s223_s18, 8 }
  0x2f   : > { %2658 = sst [smem:[#allocation25_spill]] %s2693_s14  ;;  %s47_s30 = ssub.s32 %s2140_s27, %s2693_s14 }
  0x30   : > { %s49_s10 = sor.u32 %s2307_s12, %s47_s30  ;;  %p158_p2 = scmp.eq.s32.totalorder %s47_s30, 0 }
  0x31   : > { %p50_p4 = scmp.eq.s32.totalorder %s49_s10, 0  ;;  %s1331_s11 = sshll.u32 %s2136_s26, 1 }
  0x32   : > { %s2659_s3 = sadd.s32 1, %s2100_s17  ;;  %s1703_s4 = smul.u32 192, %s2140_s27 }
  0x33   : > { %s2327_s2 = scalar_select %p158_p2, %s2100_s17, %s2659_s3  }
  0x34   : > { %s2330_s15 = scalar_select %p50_p4, %s2124_s23, %s52_s9  }
  0x35   : > { %2660 = sst [smem:[#allocation26_spill]] %s2327_s2  ;;  %s227_s8 = scalar_lea.vmem [#allocation3], %s1329_s21 }
  0x36   : > { %2661 = sst [smem:[#allocation27_spill]] %s2330_s15  ;;  %s238_s25 = sshll.u32 %s227_s8, 4  ;;  %s239_s25 = int_to_ptr.vmem [resolvable:$true] %s238_s25 }
  0x37   : > { %p1726_p6 = pnand %p1738_p0, %p2311_p8  ;;  %s233_s30 = sadd.s32 %s1703_s4, %s1331_s11 }
  0x38   : > { %s1333_s3 = sshll.u32 %s233_s30, 2  ;;  %s2662_s0 = sld [smem:[#allocation28_spill]] }
  0x39   : > { %s224_s21 = scalar_lea.sflag [#allocation4], %s223_s18  ;;  %s2148_s15 = smov 384  }
  0x3a   : > { %s2149_s8 = smov 128   ;;  %s2150_s23 = smov 8  }
  0x3b   : > { %s248_s5 = sand.u32 1, %s2144_s28   ;;  %s80_s2 = sadd.s32 1, %s2112_s20 }
  0x3c   : > { %p87_p10 = scmp.ne.s32.totalorder %s2112_s20, %s2108_s19  ;;  %s250_s4 = sand.u32 1, %s2112_s20  }
  0x3d   : > { %s2347_s17 = scalar_select %p78_p12, %s2112_s20, %s80_s2  }
  0x3e   : > { %s235_s14 = scalar_lea.hbm %s2662_s0, %s1333_s3  ;;  %p89_p8 = por %p87_p10, %p60_p7 }
  0x3f   : > { %s236_s27 = sshll.u32 %s235_s14, 4  ;;  %s1542_s11 = sshll.u32 %s2136_s26, 7  ;;  %s237_s27 = int_to_ptr.hbm [resolvable:$true] %s236_s27 }
  0x40   : > { %1728 = dma.hbm_to_vmem [thread:$0]  (!%p1726_p6), %s237_s27, 4096, %s239_s25, %s224_s21, %s2148_s15, %s2149_s8, %s2150_s23  }
  0x41   : > { %s1334_s30 = sshll.u32 %s250_s4, 7  ;;  %s258_s18 = scalar_lea.hbm %s2624_s1, %s1542_s11 }
  0x42   : > { %s259_s9 = sshll.u32 %s258_s18, 4  ;;  %s252_s10 = scalar_lea.vmem [#allocation6], %s1334_s30  ;;  %s260_s9 = int_to_ptr.hbm [resolvable:$true] %s259_s9 }
  0x43   : > { %s261_s0 = sshll.u32 %s252_s10, 4  ;;  %p1729_p2 = pnand %p1738_p0, %p89_p8  ;;  %s262_s0 = int_to_ptr.vmem [resolvable:$true] %s261_s0 }
  0x44   : > { %s249_s15 = scalar_lea.sflag [#allocation7], %s248_s5  ;;  %s2151_s23 = smov 64  }
  0x45   : > { %s2152_s2 = smov 4   ;;  %273 = sbr.rel (%p2285_p13) target bundleno = 470 (0x1d6), region = 36 }
  0x46   : > { %1731 = dma.hbm_to_vmem [thread:$0]  (!%p1729_p2), %s260_s9, 2048, %s262_s0, %s249_s15, %s2151_s23, %s2151_s23, %s2152_s2  }
  0x47   : > { %s275_s25 = sand.u32 (!%p2285_p13), 1, %s2120_s22  }
  0x48   : > { %s1338_s27 = sshll.u32 (!%p2285_p13), %s275_s25, 8  ;;  %s276_s12 = scalar_lea.sflag (!%p2285_p13), [#allocation4], %s275_s25 }
  0x49   : > { %s2361_s21 = scalar_lea.vmem (!%p2285_p13), [#allocation3], %s1338_s27 }
  0x4a   : > { %2071 = dma.done.wait (%p2257_p3), %s276_s12, 4096  }
  0x4b   : > { %2073 = vsyncadd (%p2257_p3), %s276_s12, 4294963200  ;;  %s285_s8 = sand.u32 1, %s2248_s29   ;;  %s287_s0 = sand.u32 1, %s2108_s19  }
  0x4c   : > { %s1339_s5 = sshll.u32 %s287_s0, 7  ;;  %s286_s13 = scalar_lea.sflag [#allocation7], %s285_s8 }
  0x4d   : > { %s2369_s4 = scalar_lea.vmem [#allocation6], %s1339_s5 }
  0x4e   : > { %2075 = dma.done.wait (%p2265_p5), %s286_s13, 2048  }
  0x4f   : > { %2077 = vsyncadd (%p2265_p5), %s286_s13, 4294965248 }
  0x50   : > { %2079 = dma.done.wait (%p66_p1), [#allocation7], 16  }
  0x51   : > { %2081 = vsyncadd (%p66_p1), [#allocation7], 4294967280 }
  0x52   : > { %2083 = dma.done.wait (%p66_p1), [#allocation10], 16  }
  0x53   : > { %2085 = vsyncadd (%p66_p1), [#allocation10], 4294967280  ;;  %s327_s6 = sand.u32 1, %s2096_s16   ;;  %p1343_p3 = scmp.ne.s32.totalorder %s2128_s24, 0 }
  0x54   : > { %s1342_s11 = sshll.u32 %s327_s6, 7 }
  0x55   : > { %s2386_s30 = scalar_lea.vmem [#allocation11], %s1342_s11  ;;  %337 = sbr.rel (%p1343_p3) target bundleno = 123 (0x7b), region = 56 }
  0x5a   : > { %v2153_v0 = vmov 0.0  }
  0x5b   : > { %338 = vst [vmem:[#allocation2 + $0xb0] sm:$0xff] %v2153_v0 }
  0x5c   : > { %339 = vst [vmem:[#allocation2] sm:$0xff] %v2153_v0 }
  0x5d   : > { %340 = vst [vmem:[#allocation2 + $0xd8] sm:$0xff] %v2153_v0 }
  0x5e   : > { %341 = vst [vmem:[#allocation2 + $0x18] sm:$0xff] %v2153_v0 }
  0x5f   : > { %342 = vst [vmem:[#allocation2 + $0x50] sm:$0xff] %v2153_v0 }
  0x60   : > { %343 = vst [vmem:[#allocation2 + $0x68] sm:$0xff] %v2153_v0 }
  0x61   : > { %344 = vst [vmem:[#allocation2 + $0x30] sm:$0xff] %v2153_v0 }
  0x62   : > { %345 = vst [vmem:[#allocation2 + $0x48] sm:$0xff] %v2153_v0 }
  0x63   : > { %346 = vst [vmem:[#allocation2 + $0x80] sm:$0xff] %v2153_v0 }
  0x64   : > { %347 = vst [vmem:[#allocation2 + $0x88] sm:$0xff] %v2153_v0 }
  0x65   : > { %348 = vst [vmem:[#allocation2 + $0xe8] sm:$0xff] %v2153_v0 }
  0x66   : > { %349 = vst [vmem:[#allocation2 + $0xb8] sm:$0xff] %v2153_v0 }
  0x67   : > { %350 = vst [vmem:[#allocation2 + $0x60] sm:$0xff] %v2153_v0 }
  0x68   : > { %351 = vst [vmem:[#allocation2 + $0xf0] sm:$0xff] %v2153_v0 }
  0x69   : > { %352 = vst [vmem:[#allocation2 + $0x8] sm:$0xff] %v2153_v0 }
  0x6a   : > { %353 = vst [vmem:[#allocation2 + $0x78] sm:$0xff] %v2153_v0 }
  0x6b   : > { %354 = vst [vmem:[#allocation2 + $0x38] sm:$0xff] %v2153_v0 }
  0x6c   : > { %355 = vst [vmem:[#allocation2 + $0x58] sm:$0xff] %v2153_v0 }
  0x6d   : > { %356 = vst [vmem:[#allocation2 + $0x40] sm:$0xff] %v2153_v0 }
  0x6e   : > { %357 = vst [vmem:[#allocation2 + $0xc8] sm:$0xff] %v2153_v0 }
  0x6f   : > { %358 = vst [vmem:[#allocation2 + $0xe0] sm:$0xff] %v2153_v0 }
  0x70   : > { %359 = vst [vmem:[#allocation2 + $0x90] sm:$0xff] %v2153_v0 }
  0x71   : > { %360 = vst [vmem:[#allocation2 + $0x70] sm:$0xff] %v2153_v0 }
  0x72   : > { %361 = vst [vmem:[#allocation2 + $0xc0] sm:$0xff] %v2153_v0 }
  0x73   : > { %362 = vst [vmem:[#allocation2 + $0xa8] sm:$0xff] %v2153_v0 }
  0x74   : > { %363 = vst [vmem:[#allocation2 + $0xd0] sm:$0xff] %v2153_v0 }
  0x75   : > { %364 = vst [vmem:[#allocation2 + $0x10] sm:$0xff] %v2153_v0 }
  0x76   : > { %365 = vst [vmem:[#allocation2 + $0x28] sm:$0xff] %v2153_v0 }
  0x77   : > { %366 = vst [vmem:[#allocation2 + $0xa0] sm:$0xff] %v2153_v0 }
  0x78   : > { %367 = vst [vmem:[#allocation2 + $0xf8] sm:$0xff] %v2153_v0 }
  0x79   : > { %368 = vst [vmem:[#allocation2 + $0x20] sm:$0xff] %v2153_v0 }
  0x7a   : > { %369 = vst [vmem:[#allocation2 + $0x98] sm:$0xff] %v2153_v0 }
  0x7b PF: > { %v1582_v1 = vld [vmem:[%s2369_s4 + $0x38] sm:$0xff]  ;;  %v1581_v3 = vld [vmem:[%s2369_s4 + $0x30] sm:$0xff]  ;;  %v1580_v5 = vld [vmem:[%s2369_s4 + $0x28] sm:$0xff]  ;;  %p1536_p1 = scmp.ne.s32.totalorder %s2128_s24, 2 }
  0x7c   : > { %v1590_v2 = vld [vmem:[%s2369_s4 + $0x78] sm:$0xff]  ;;  %722 = vmatpush.bf16.msra.mxu0 %v1582_v1  ;;  %1687 = vmatpush.bf16.msra.mxu2 %v1582_v1  ;;  %v1589_v4 = vld [vmem:[%s2369_s4 + $0x70] sm:$0xff]  ;;  %v1588_v6 = vld [vmem:[%s2369_s4 + $0x68] sm:$0xff] }
  0x7d   : > { %811 = vmatpush.bf16.msra.mxu1 %v1590_v2  ;;  %1695 = vmatpush.bf16.msra.mxu3 %v1590_v2  ;;  %v1579_v7 = vld [vmem:[%s2369_s4 + $0x20] sm:$0xff]  ;;  %v1578_v9 = vld [vmem:[%s2369_s4 + $0x18] sm:$0xff]  ;;  %v1577_v11 = vld [vmem:[%s2369_s4 + $0x10] sm:$0xff] }
  0x7e   : > { %v1587_v8 = vld [vmem:[%s2369_s4 + $0x60] sm:$0xff]  ;;  %v1586_v10 = vld [vmem:[%s2369_s4 + $0x58] sm:$0xff]  ;;  %v1585_v12 = vld [vmem:[%s2369_s4 + $0x50] sm:$0xff] }
  0x7f   : > { %v1576_v13 = vld [vmem:[%s2369_s4 + $0x8] sm:$0xff]  ;;  %v1575_v15 = vld [vmem:[%s2369_s4] sm:$0xff]  ;;  %v1354_v29 = vld [vmem:[%s2361_s21 + $0x10] sm:$0xf] }
  0x80   : > { %723 = vmatpush.bf16.msra.mxu0 %v1581_v3  ;;  %1688 = vmatpush.bf16.msra.mxu2 %v1581_v3  ;;  %v1584_v14 = vld [vmem:[%s2369_s4 + $0x48] sm:$0xff]  ;;  %v1583_v16 = vld [vmem:[%s2369_s4 + $0x40] sm:$0xff]  ;;  %v1546_v30 = vld [vmem:[%s2361_s21 + $0x14] sm:$0xf0] }
  0x81   : > { %812 = vmatpush.bf16.msra.mxu1 %v1589_v4  ;;  %1696 = vmatpush.bf16.msra.mxu3 %v1589_v4  ;;  %v1346_v17 = vld [vmem:[%s2361_s21] sm:$0xf]  ;;  %v1544_v18 = vld [vmem:[%s2361_s21 + $0x4] sm:$0xf0]  ;;  %v1543_v21 = vld [vmem:[%s2361_s21 + $0x4] sm:$0xf]  ;;  %v1355_v37 = vor.u32 %v1546_v30, %v1354_v29 }
  0x82   : > { %v1410_v19 = vld [vmem:[%s2361_s21 + $0x80] sm:$0xf]  ;;  %v1560_v20 = vld [vmem:[%s2361_s21 + $0x84] sm:$0xf0]  ;;  %v1348_v22 = vld [vmem:[%s2361_s21 + $0x8] sm:$0xf0]  ;;  %v1347_v25 = vor.u32 %v1544_v18, %v1346_v17 }
  0x83   : > { %v1559_v23 = vld [vmem:[%s2361_s21 + $0x84] sm:$0xf]  ;;  %v1412_v24 = vld [vmem:[%s2361_s21 + $0x88] sm:$0xf0]  ;;  %v1411_v26 = vor.u32 %v1560_v20, %v1410_v19  ;;  %v1351_v27 = vor.u32 %v1543_v21, %v1348_v22  ;;  %v1418_v31 = vld [vmem:[%s2361_s21 + $0x90] sm:$0xf] }
  0x84   : > { %724 = vmatpush.bf16.msra.mxu0 %v1580_v5  ;;  %1689 = vmatpush.bf16.msra.mxu2 %v1580_v5  ;;  %v1415_v28 = vor.u32 %v1559_v23, %v1412_v24  ;;  %v1562_v32 = vld [vmem:[%s2361_s21 + $0x94] sm:$0xf0]  ;;  %v1545_v33 = vld [vmem:[%s2361_s21 + $0x14] sm:$0xf]  ;;  %v1356_v34 = vld [vmem:[%s2361_s21 + $0x18] sm:$0xf0] }
  0x85   : > { %813 = vmatpush.bf16.msra.mxu1 %v1588_v6  ;;  %1697 = vmatpush.bf16.msra.mxu3 %v1588_v6  ;;  %v1561_v35 = vld [vmem:[%s2361_s21 + $0x94] sm:$0xf]  ;;  %v1420_v36 = vld [vmem:[%s2361_s21 + $0x98] sm:$0xf0]  ;;  %v1419_v38 = vor.u32 %v1562_v32, %v1418_v31  ;;  %v1359_v39 = vor.u32 %v1545_v33, %v1356_v34  ;;  %v1362_v41 = vld [vmem:[%s2361_s21 + $0x20] sm:$0xf] }
  0x86   : > { %v1423_v40 = vor.u32 %v1561_v35, %v1420_v36  ;;  %v1548_v42 = vld [vmem:[%s2361_s21 + $0x24] sm:$0xf0]  ;;  %v1426_v43 = vld [vmem:[%s2361_s21 + $0xa0] sm:$0xf]  ;;  %v1547_v45 = vld [vmem:[%s2361_s21 + $0x24] sm:$0xf] }
  0x87   : > { %v1564_v44 = vld [vmem:[%s2361_s21 + $0xa4] sm:$0xf0]  ;;  %v1364_v46 = vld [vmem:[%s2361_s21 + $0x28] sm:$0xf0]  ;;  %v1563_v47 = vld [vmem:[%s2361_s21 + $0xa4] sm:$0xf]  ;;  %v1363_v49 = vor.u32 %v1548_v42, %v1362_v41 }
  0x88   : > { %725 = vmatpush.bf16.msra.mxu0 %v1579_v7  ;;  %1690 = vmatpush.bf16.msra.mxu2 %v1579_v7  ;;  %v1428_v48 = vld [vmem:[%s2361_s21 + $0xa8] sm:$0xf0]  ;;  %v1427_v50 = vor.u32 %v1564_v44, %v1426_v43  ;;  %v1367_v51 = vor.u32 %v1547_v45, %v1364_v46  ;;  %v1370_v53 = vld [vmem:[%s2361_s21 + $0x30] sm:$0xf]  ;;  %v1550_v54 = vld [vmem:[%s2361_s21 + $0x34] sm:$0xf0] }
  0x89   : > { %814 = vmatpush.bf16.msra.mxu1 %v1587_v8  ;;  %1698 = vmatpush.bf16.msra.mxu3 %v1587_v8  ;;  %v1431_v52 = vor.u32 %v1563_v47, %v1428_v48  ;;  %v1434_v55 = vld [vmem:[%s2361_s21 + $0xb0] sm:$0xf]  ;;  %v1566_v56 = vld [vmem:[%s2361_s21 + $0xb4] sm:$0xf0]  ;;  %v1549_v57 = vld [vmem:[%s2361_s21 + $0x34] sm:$0xf]  ;;  %v1371_v61 = vor.u32 %v1550_v54, %v1370_v53 }
  0x8a   : > { %v1372_v58 = vld [vmem:[%s2361_s21 + $0x38] sm:$0xf0]  ;;  %v1565_v59 = vld [vmem:[%s2361_s21 + $0xb4] sm:$0xf]  ;;  %v1435_v62 = vor.u32 %v1566_v56, %v1434_v55  ;;  %v1378_v1 = vld [vmem:[%s2361_s21 + $0x40] sm:$0xf] }
  0x8b   : > { %v1436_v60 = vld [vmem:[%s2361_s21 + $0xb8] sm:$0xf0]  ;;  %v1375_v63 = vor.u32 %v1549_v57, %v1372_v58  ;;  %v1552_v2 = vld [vmem:[%s2361_s21 + $0x44] sm:$0xf0]  ;;  %v1442_v3 = vld [vmem:[%s2361_s21 + $0xc0] sm:$0xf] }
  0x8c   : > { %726 = vmatpush.bf16.msra.mxu0 %v1578_v9  ;;  %1691 = vmatpush.bf16.msra.mxu2 %v1578_v9  ;;  %v1439_v0 = vor.u32 %v1565_v59, %v1436_v60  ;;  %v1568_v4 = vld [vmem:[%s2361_s21 + $0xc4] sm:$0xf0]  ;;  %v1551_v5 = vld [vmem:[%s2361_s21 + $0x44] sm:$0xf]  ;;  %v1380_v6 = vld [vmem:[%s2361_s21 + $0x48] sm:$0xf0]  ;;  %v1379_v9 = vor.u32 %v1552_v2, %v1378_v1 }
  0x8d   : > { %815 = vmatpush.bf16.msra.mxu1 %v1586_v10  ;;  %1699 = vmatpush.bf16.msra.mxu3 %v1586_v10  ;;  %v1567_v7 = vld [vmem:[%s2361_s21 + $0xc4] sm:$0xf]  ;;  %v1444_v8 = vld [vmem:[%s2361_s21 + $0xc8] sm:$0xf0]  ;;  %v1443_v10 = vor.u32 %v1568_v4, %v1442_v3  ;;  %v1553_v17 = vld [vmem:[%s2361_s21 + $0x54] sm:$0xf] }
  0x8e   : > { %v1388_v18 = vld [vmem:[%s2361_s21 + $0x58] sm:$0xf0]  ;;  %v1569_v19 = vld [vmem:[%s2361_s21 + $0xd4] sm:$0xf]  ;;  %v1555_v29 = vld [vmem:[%s2361_s21 + $0x64] sm:$0xf] }
  0x8f   : > { %v1452_v20 = vld [vmem:[%s2361_s21 + $0xd8] sm:$0xf0]  ;;  %v1391_v23 = vor.u32 %v1553_v17, %v1388_v18  ;;  %v1396_v30 = vld [vmem:[%s2361_s21 + $0x68] sm:$0xf0]  ;;  %v1571_v31 = vld [vmem:[%s2361_s21 + $0xe4] sm:$0xf] }
  0x90   : > { %727 = vmatpush.bf16.msra.mxu0 %v1577_v11  ;;  %1692 = vmatpush.bf16.msra.mxu2 %v1577_v11  ;;  %v1383_v11 = vor.u32 %v1551_v5, %v1380_v6  ;;  %v1455_v24 = vor.u32 %v1569_v19, %v1452_v20  ;;  %v1460_v32 = vld [vmem:[%s2361_s21 + $0xe8] sm:$0xf0]  ;;  %v1399_v35 = vor.u32 %v1555_v29, %v1396_v30  ;;  %v1557_v41 = vld [vmem:[%s2361_s21 + $0x74] sm:$0xf]  ;;  %v1404_v42 = vld [vmem:[%s2361_s21 + $0x78] sm:$0xf0] }
  0x91   : > { %816 = vmatpush.bf16.msra.mxu1 %v1585_v12  ;;  %1700 = vmatpush.bf16.msra.mxu3 %v1585_v12  ;;  %v1447_v12 = vor.u32 %v1567_v7, %v1444_v8  ;;  %v1463_v36 = vor.u32 %v1571_v31, %v1460_v32  ;;  %v1573_v43 = vld [vmem:[%s2361_s21 + $0xf4] sm:$0xf]  ;;  %v1468_v44 = vld [vmem:[%s2361_s21 + $0xf8] sm:$0xf0]  ;;  %v1407_v47 = vor.u32 %v1557_v41, %v1404_v42  ;;  %v371_v59 = vld [vmem:[#allocation2] sm:$0xff] }
  0x92   : > { %v1471_v48 = vor.u32 %v1573_v43, %v1468_v44  ;;  %v386_v55 = vld [vmem:[#allocation2 + $0x38] sm:$0xff]  ;;  %v390_v31 = vld [vmem:[#allocation2 + $0xe0] sm:$0xff]  ;;  %v391_v41 = vld [vmem:[#allocation2 + $0x90] sm:$0xff] }
  0x93   : > { %v387_v1 = vld [vmem:[#allocation2 + $0x58] sm:$0xff] }
  0x94   : > { %728 = vmatpush.bf16.msra.mxu0 %v1576_v13  ;;  %1693 = vmatpush.bf16.msra.mxu2 %v1576_v13  ;;  %v1386_v13 = vld [vmem:[%s2361_s21 + $0x50] sm:$0xf]  ;;  %v372_v5 = vld [vmem:[#allocation2 + $0xd8] sm:$0xff] }
  0x95   : > { %817 = vmatpush.bf16.msra.mxu1 %v1584_v14  ;;  %1701 = vmatpush.bf16.msra.mxu3 %v1584_v14  ;;  %v1554_v14 = vld [vmem:[%s2361_s21 + $0x54] sm:$0xf0] }
  0x96   : > { %v1387_v21 = vor.u32 %v1554_v14, %v1386_v13 }
  0x98   : > { %729 = vmatpush.bf16.msra.mxu0 %v1575_v15  ;;  %1694 = vmatpush.bf16.msra.mxu2 %v1575_v15  ;;  %v1450_v15 = vld [vmem:[%s2361_s21 + $0xd0] sm:$0xf] }
  0x99   : > { %818 = vmatpush.bf16.msra.mxu1 %v1583_v16  ;;  %1702 = vmatpush.bf16.msra.mxu3 %v1583_v16  ;;  %v1570_v16 = vld [vmem:[%s2361_s21 + $0xd4] sm:$0xf0] }
  0x9a   : > { %v1451_v22 = vor.u32 %v1570_v16, %v1450_v15  ;;  %v373_v15 = vld [vmem:[#allocation2 + $0x18] sm:$0xff] }
  0x9b   : > { %730 = vmatmul.bf16.vlgmr.msra.gmra.mxu0 %v1347_v25  ;;  %770 = vmatmul.bf16.vlgmr.msra.gmra.mxu2 %v1411_v26  ;;  %v1394_v25 = vld [vmem:[%s2361_s21 + $0x60] sm:$0xf]  ;;  %v1556_v26 = vld [vmem:[%s2361_s21 + $0x64] sm:$0xf0] }
  0x9c   : > { %819 = vmatmul.bf16.vlgmr.msra.gmra.mxu1 %v1351_v27  ;;  %859 = vmatmul.bf16.vlgmr.msra.gmra.mxu3 %v1415_v28  ;;  %v1458_v27 = vld [vmem:[%s2361_s21 + $0xe0] sm:$0xf]  ;;  %v1572_v28 = vld [vmem:[%s2361_s21 + $0xe4] sm:$0xf0]  ;;  %v1395_v33 = vor.u32 %v1556_v26, %v1394_v25  ;;  %v374_v25 = vld [vmem:[#allocation2 + $0x50] sm:$0xff] }
  0x9d   : > { %v1459_v34 = vor.u32 %v1572_v28, %v1458_v27 }
  0xab   : > { %735 = vmatmul.bf16.gmra.mxu0 %v1355_v37  ;;  %775 = vmatmul.bf16.gmra.mxu2 %v1419_v38  ;;  %v1402_v37 = vld [vmem:[%s2361_s21 + $0x70] sm:$0xf]  ;;  %v1558_v38 = vld [vmem:[%s2361_s21 + $0x74] sm:$0xf0] }
  0xac   : > { %824 = vmatmul.bf16.gmra.mxu1 %v1359_v39  ;;  %864 = vmatmul.bf16.gmra.mxu3 %v1423_v40  ;;  %v1466_v39 = vld [vmem:[%s2361_s21 + $0xf0] sm:$0xf]  ;;  %v1574_v40 = vld [vmem:[%s2361_s21 + $0xf4] sm:$0xf0]  ;;  %v1403_v45 = vor.u32 %v1558_v38, %v1402_v37 }
  0xad   : > { %v1467_v46 = vor.u32 %v1574_v40, %v1466_v39 }
  0xbb   : > { %740 = vmatmul.bf16.gmra.mxu0 %v1363_v49  ;;  %780 = vmatmul.bf16.gmra.mxu2 %v1427_v50  ;;  %v370_v50 = vld [vmem:[#allocation2 + $0xb0] sm:$0xff] }
  0xbc   : > { %829 = vmatmul.bf16.gmra.mxu1 %v1367_v51  ;;  %869 = vmatmul.bf16.gmra.mxu3 %v1431_v52 }
  0xcb   : > { %745 = vmatmul.bf16.gmra.mxu0 %v1371_v61  ;;  %785 = vmatmul.bf16.gmra.mxu2 %v1435_v62 }
  0xcc   : > { %834 = vmatmul.bf16.gmra.mxu1 %v1375_v63  ;;  %874 = vmatmul.bf16.gmra.mxu3 %v1439_v0 }
  0xdb   : > { %750 = vmatmul.bf16.gmra.mxu0 %v1379_v9  ;;  %790 = vmatmul.bf16.gmra.mxu2 %v1443_v10 }
  0xdc   : > { %839 = vmatmul.bf16.gmra.mxu1 %v1383_v11  ;;  %879 = vmatmul.bf16.gmra.mxu3 %v1447_v12  ;;  %v388_v11 = vld [vmem:[#allocation2 + $0x40] sm:$0xff] }
  0xeb   : > { %755 = vmatmul.bf16.gmra.mxu0 %v1387_v21  ;;  %795 = vmatmul.bf16.gmra.mxu2 %v1451_v22  ;;  %v389_v21 = vld [vmem:[#allocation2 + $0xc8] sm:$0xff] }
  0xec   : > { %844 = vmatmul.bf16.gmra.mxu1 %v1391_v23  ;;  %884 = vmatmul.bf16.gmra.mxu3 %v1455_v24 }
  0xfb   : > { %760 = vmatmul.bf16.gmra.mxu0 %v1395_v33  ;;  %800 = vmatmul.bf16.gmra.mxu2 %v1459_v34 }
  0xfc   : > { %849 = vmatmul.bf16.gmra.mxu1 %v1399_v35  ;;  %889 = vmatmul.bf16.gmra.mxu3 %v1463_v36  ;;  %v375_v35 = vld [vmem:[#allocation2 + $0x68] sm:$0xff] }
 0x10b   : > { %765 = vmatmul.bf16.gmra.mxu0 %v1403_v45  ;;  %805 = vmatmul.bf16.gmra.mxu2 %v1467_v46  ;;  %v376_v45 = vld [vmem:[#allocation2 + $0x30] sm:$0xff] }
 0x10c   : > { %854 = vmatmul.bf16.gmra.mxu1 %v1407_v47  ;;  %894 = vmatmul.bf16.gmra.mxu3 %v1471_v48 }
 0x118   : > { %v731_v49 = vpop.f32.mrf.mxu0 }
 0x119   : > { %v820_v51 = vpop.f32.mrf.mxu1 }
 0x11a   : > { %v821_v52 = vadd.f32 %v820_v51, %v731_v49  ;;  %v392_v51 = vld [vmem:[#allocation2 + $0x70] sm:$0xff] }
 0x11c   : > { %v900_v53 = vadd.f32 %v821_v52, %v370_v50 }
 0x11e   : > { %932 = vst [vmem:[#allocation2 + $0xb0] sm:$0xff] %v900_v53  ;;  %v771_v54 = vpop.f32.mrf.mxu2 }
 0x11f   : > { %v860_v56 = vpop.f32.mrf.mxu3 }
 0x120   : > { %v861_v57 = vadd.f32 %v860_v56, %v771_v54  ;;  %v733_v58 = vpop.f32.mrf.mxu0 }
 0x121   : > { %v822_v60 = vpop.f32.mrf.mxu1 }
 0x122   : > { %v916_v61 = vadd.f32 %v861_v57, %v386_v55  ;;  %v823_v62 = vadd.f32 %v822_v60, %v733_v58  ;;  %v377_v55 = vld [vmem:[#allocation2 + $0x48] sm:$0xff] }
 0x124   : > { %948 = vst [vmem:[#allocation2 + $0x38] sm:$0xff] %v916_v61  ;;  %v901_v63 = vadd.f32 %v823_v62, %v371_v59  ;;  %v393_v61 = vld [vmem:[#allocation2 + $0xc0] sm:$0xff] }
 0x126   : > { %933 = vst [vmem:[#allocation2] sm:$0xff] %v901_v63  ;;  %v773_v0 = vpop.f32.mrf.mxu2 }
 0x127   : > { %v862_v2 = vpop.f32.mrf.mxu3 }
 0x128   : > { %v863_v3 = vadd.f32 %v862_v2, %v773_v0  ;;  %v736_v4 = vpop.f32.mrf.mxu0 }
 0x129   : > { %v825_v6 = vpop.f32.mrf.mxu1 }
 0x12a   : > { %v917_v7 = vadd.f32 %v863_v3, %v387_v1  ;;  %v826_v8 = vadd.f32 %v825_v6, %v736_v4  ;;  %v378_v1 = vld [vmem:[#allocation2 + $0x80] sm:$0xff] }
 0x12c   : > { %949 = vst [vmem:[#allocation2 + $0x58] sm:$0xff] %v917_v7  ;;  %v902_v9 = vadd.f32 %v826_v8, %v372_v5  ;;  %v394_v7 = vld [vmem:[#allocation2 + $0xa8] sm:$0xff] }
 0x12e   : > { %934 = vst [vmem:[#allocation2 + $0xd8] sm:$0xff] %v902_v9  ;;  %v776_v10 = vpop.f32.mrf.mxu2 }
 0x12f   : > { %v865_v12 = vpop.f32.mrf.mxu3 }
 0x130   : > { %v866_v13 = vadd.f32 %v865_v12, %v776_v10  ;;  %v738_v14 = vpop.f32.mrf.mxu0 }
 0x131   : > { %v827_v16 = vpop.f32.mrf.mxu1 }
 0x132   : > { %v918_v17 = vadd.f32 %v866_v13, %v388_v11  ;;  %v828_v18 = vadd.f32 %v827_v16, %v738_v14  ;;  %v379_v11 = vld [vmem:[#allocation2 + $0x88] sm:$0xff] }
 0x134   : > { %950 = vst [vmem:[#allocation2 + $0x40] sm:$0xff] %v918_v17  ;;  %v903_v19 = vadd.f32 %v828_v18, %v373_v15  ;;  %v395_v17 = vld [vmem:[#allocation2 + $0xd0] sm:$0xff] }
 0x136   : > { %935 = vst [vmem:[#allocation2 + $0x18] sm:$0xff] %v903_v19  ;;  %v778_v20 = vpop.f32.mrf.mxu2 }
 0x137   : > { %v867_v22 = vpop.f32.mrf.mxu3 }
 0x138   : > { %v868_v23 = vadd.f32 %v867_v22, %v778_v20  ;;  %v741_v24 = vpop.f32.mrf.mxu0 }
 0x139   : > { %v830_v26 = vpop.f32.mrf.mxu1 }
 0x13a   : > { %v919_v27 = vadd.f32 %v868_v23, %v389_v21  ;;  %v831_v28 = vadd.f32 %v830_v26, %v741_v24  ;;  %v380_v21 = vld [vmem:[#allocation2 + $0xe8] sm:$0xff] }
 0x13c   : > { %951 = vst [vmem:[#allocation2 + $0xc8] sm:$0xff] %v919_v27  ;;  %v904_v29 = vadd.f32 %v831_v28, %v374_v25  ;;  %v396_v27 = vld [vmem:[#allocation2 + $0x10] sm:$0xff] }
 0x13e   : > { %936 = vst [vmem:[#allocation2 + $0x50] sm:$0xff] %v904_v29  ;;  %v781_v30 = vpop.f32.mrf.mxu2 }
 0x13f   : > { %v870_v32 = vpop.f32.mrf.mxu3 }
 0x140   : > { %v871_v33 = vadd.f32 %v870_v32, %v781_v30  ;;  %v743_v34 = vpop.f32.mrf.mxu0 }
 0x141   : > { %v832_v36 = vpop.f32.mrf.mxu1 }
 0x142   : > { %v920_v37 = vadd.f32 %v871_v33, %v390_v31  ;;  %v833_v38 = vadd.f32 %v832_v36, %v743_v34  ;;  %v381_v31 = vld [vmem:[#allocation2 + $0xb8] sm:$0xff] }
 0x144   : > { %952 = vst [vmem:[#allocation2 + $0xe0] sm:$0xff] %v920_v37  ;;  %v905_v39 = vadd.f32 %v833_v38, %v375_v35  ;;  %v397_v37 = vld [vmem:[#allocation2 + $0x28] sm:$0xff] }
 0x146   : > { %937 = vst [vmem:[#allocation2 + $0x68] sm:$0xff] %v905_v39  ;;  %v783_v40 = vpop.f32.mrf.mxu2 }
 0x147   : > { %v872_v42 = vpop.f32.mrf.mxu3 }
 0x148   : > { %v873_v43 = vadd.f32 %v872_v42, %v783_v40  ;;  %v746_v44 = vpop.f32.mrf.mxu0 }
 0x149   : > { %v835_v46 = vpop.f32.mrf.mxu1 }
 0x14a   : > { %v921_v47 = vadd.f32 %v873_v43, %v391_v41  ;;  %v836_v48 = vadd.f32 %v835_v46, %v746_v44  ;;  %v382_v41 = vld [vmem:[#allocation2 + $0x60] sm:$0xff] }
 0x14c   : > { %953 = vst [vmem:[#allocation2 + $0x90] sm:$0xff] %v921_v47  ;;  %v906_v49 = vadd.f32 %v836_v48, %v376_v45  ;;  %v398_v47 = vld [vmem:[#allocation2 + $0xa0] sm:$0xff] }
 0x14e   : > { %938 = vst [vmem:[#allocation2 + $0x30] sm:$0xff] %v906_v49  ;;  %v786_v50 = vpop.f32.mrf.mxu2 }
 0x14f   : > { %v875_v52 = vpop.f32.mrf.mxu3 }
 0x150   : > { %v876_v53 = vadd.f32 %v875_v52, %v786_v50  ;;  %v748_v54 = vpop.f32.mrf.mxu0 }
 0x151   : > { %v837_v56 = vpop.f32.mrf.mxu1 }
 0x152   : > { %v922_v57 = vadd.f32 %v876_v53, %v392_v51  ;;  %v838_v58 = vadd.f32 %v837_v56, %v748_v54  ;;  %v383_v51 = vld [vmem:[#allocation2 + $0xf0] sm:$0xff] }
 0x154   : > { %954 = vst [vmem:[#allocation2 + $0x70] sm:$0xff] %v922_v57  ;;  %v907_v59 = vadd.f32 %v838_v58, %v377_v55  ;;  %v399_v57 = vld [vmem:[#allocation2 + $0xf8] sm:$0xff] }
 0x156   : > { %939 = vst [vmem:[#allocation2 + $0x48] sm:$0xff] %v907_v59  ;;  %v788_v60 = vpop.f32.mrf.mxu2 }
 0x157   : > { %v877_v62 = vpop.f32.mrf.mxu3 }
 0x158   : > { %v878_v63 = vadd.f32 %v877_v62, %v788_v60  ;;  %v751_v0 = vpop.f32.mrf.mxu0 }
 0x159   : > { %v840_v2 = vpop.f32.mrf.mxu1 }
 0x15a   : > { %v923_v3 = vadd.f32 %v878_v63, %v393_v61  ;;  %v841_v4 = vadd.f32 %v840_v2, %v751_v0  ;;  %v384_v61 = vld [vmem:[#allocation2 + $0x8] sm:$0xff] }
 0x15c   : > { %955 = vst [vmem:[#allocation2 + $0xc0] sm:$0xff] %v923_v3  ;;  %v908_v5 = vadd.f32 %v841_v4, %v378_v1  ;;  %v400_v3 = vld [vmem:[#allocation2 + $0x20] sm:$0xff] }
 0x15e   : > { %940 = vst [vmem:[#allocation2 + $0x80] sm:$0xff] %v908_v5  ;;  %v791_v6 = vpop.f32.mrf.mxu2 }
 0x15f   : > { %v880_v8 = vpop.f32.mrf.mxu3 }
 0x160   : > { %v881_v9 = vadd.f32 %v880_v8, %v791_v6  ;;  %v753_v10 = vpop.f32.mrf.mxu0 }
 0x161   : > { %v842_v12 = vpop.f32.mrf.mxu1 }
 0x162   : > { %v924_v13 = vadd.f32 %v881_v9, %v394_v7  ;;  %v843_v14 = vadd.f32 %v842_v12, %v753_v10  ;;  %v385_v7 = vld [vmem:[#allocation2 + $0x78] sm:$0xff] }
 0x164   : > { %956 = vst [vmem:[#allocation2 + $0xa8] sm:$0xff] %v924_v13  ;;  %v909_v15 = vadd.f32 %v843_v14, %v379_v11  ;;  %v401_v13 = vld [vmem:[#allocation2 + $0x98] sm:$0xff] }
 0x166   : > { %941 = vst [vmem:[#allocation2 + $0x88] sm:$0xff] %v909_v15  ;;  %v793_v16 = vpop.f32.mrf.mxu2 }
 0x167   : > { %v882_v18 = vpop.f32.mrf.mxu3 }
 0x168   : > { %v883_v19 = vadd.f32 %v882_v18, %v793_v16  ;;  %v756_v20 = vpop.f32.mrf.mxu0 }
 0x169   : > { %v845_v22 = vpop.f32.mrf.mxu1 }
 0x16a   : > { %v925_v23 = vadd.f32 %v883_v19, %v395_v17  ;;  %v846_v24 = vadd.f32 %v845_v22, %v756_v20 }
 0x16c   : > { %957 = vst [vmem:[#allocation2 + $0xd0] sm:$0xff] %v925_v23  ;;  %v910_v25 = vadd.f32 %v846_v24, %v380_v21 }
 0x16e   : > { %942 = vst [vmem:[#allocation2 + $0xe8] sm:$0xff] %v910_v25  ;;  %v796_v26 = vpop.f32.mrf.mxu2 }
 0x16f   : > { %v885_v28 = vpop.f32.mrf.mxu3 }
 0x170   : > { %v886_v29 = vadd.f32 %v885_v28, %v796_v26  ;;  %v758_v30 = vpop.f32.mrf.mxu0 }
 0x171   : > { %v847_v32 = vpop.f32.mrf.mxu1 }
 0x172   : > { %v926_v33 = vadd.f32 %v886_v29, %v396_v27  ;;  %v848_v34 = vadd.f32 %v847_v32, %v758_v30 }
 0x174   : > { %958 = vst [vmem:[#allocation2 + $0x10] sm:$0xff] %v926_v33  ;;  %v911_v35 = vadd.f32 %v848_v34, %v381_v31 }
 0x176   : > { %943 = vst [vmem:[#allocation2 + $0xb8] sm:$0xff] %v911_v35  ;;  %v798_v36 = vpop.f32.mrf.mxu2 }
 0x177   : > { %v887_v38 = vpop.f32.mrf.mxu3 }
 0x178   : > { %v888_v39 = vadd.f32 %v887_v38, %v798_v36  ;;  %v761_v40 = vpop.f32.mrf.mxu0 }
 0x179   : > { %v850_v42 = vpop.f32.mrf.mxu1 }
 0x17a   : > { %v927_v43 = vadd.f32 %v888_v39, %v397_v37  ;;  %v851_v44 = vadd.f32 %v850_v42, %v761_v40 }
 0x17c   : > { %959 = vst [vmem:[#allocation2 + $0x28] sm:$0xff] %v927_v43  ;;  %v912_v45 = vadd.f32 %v851_v44, %v382_v41 }
 0x17e   : > { %944 = vst [vmem:[#allocation2 + $0x60] sm:$0xff] %v912_v45  ;;  %v801_v46 = vpop.f32.mrf.mxu2 }
 0x17f   : > { %v890_v48 = vpop.f32.mrf.mxu3 }
 0x180   : > { %v891_v49 = vadd.f32 %v890_v48, %v801_v46  ;;  %v763_v50 = vpop.f32.mrf.mxu0 }
 0x181   : > { %v852_v52 = vpop.f32.mrf.mxu1 }
 0x182   : > { %v928_v53 = vadd.f32 %v891_v49, %v398_v47  ;;  %v853_v54 = vadd.f32 %v852_v52, %v763_v50 }
 0x184   : > { %960 = vst [vmem:[#allocation2 + $0xa0] sm:$0xff] %v928_v53  ;;  %v913_v55 = vadd.f32 %v853_v54, %v383_v51 }
 0x186   : > { %945 = vst [vmem:[#allocation2 + $0xf0] sm:$0xff] %v913_v55  ;;  %v803_v56 = vpop.f32.mrf.mxu2 }
 0x187   : > { %v892_v58 = vpop.f32.mrf.mxu3 }
 0x188   : > { %v893_v59 = vadd.f32 %v892_v58, %v803_v56  ;;  %v766_v60 = vpop.f32.mrf.mxu0 }
 0x189   : > { %v855_v62 = vpop.f32.mrf.mxu1 }
 0x18a   : > { %v929_v63 = vadd.f32 %v893_v59, %v399_v57  ;;  %v856_v0 = vadd.f32 %v855_v62, %v766_v60 }
 0x18c   : > { %961 = vst [vmem:[#allocation2 + $0xf8] sm:$0xff] %v929_v63  ;;  %v914_v1 = vadd.f32 %v856_v0, %v384_v61 }
 0x18e   : > { %946 = vst [vmem:[#allocation2 + $0x8] sm:$0xff] %v914_v1  ;;  %v806_v2 = vpop.f32.mrf.mxu2 }
 0x18f   : > { %v895_v4 = vpop.f32.mrf.mxu3 }
 0x190   : > { %v896_v5 = vadd.f32 %v895_v4, %v806_v2  ;;  %v768_v6 = vpop.f32.mrf.mxu0 }
 0x191   : > { %v857_v8 = vpop.f32.mrf.mxu1 }
 0x192   : > { %v930_v9 = vadd.f32 %v896_v5, %v400_v3  ;;  %v858_v10 = vadd.f32 %v857_v8, %v768_v6 }
 0x194   : > { %962 = vst [vmem:[#allocation2 + $0x20] sm:$0xff] %v930_v9  ;;  %v915_v11 = vadd.f32 %v858_v10, %v385_v7 }
 0x196   : > { %947 = vst [vmem:[#allocation2 + $0x78] sm:$0xff] %v915_v11  ;;  %v808_v12 = vpop.f32.mrf.mxu2 }
 0x197   : > { %v897_v14 = vpop.f32.mrf.mxu3 }
 0x198   : > { %v898_v15 = vadd.f32 %v897_v14, %v808_v12  ;;  %967 = sbr.rel (%p1536_p1) target bundleno = 448 (0x1c0), region = 60 }
 0x19a   : > { %v931_v16 = vadd.f32 %v898_v15, %v401_v13 }
 0x19c   : > { %963 = vst [vmem:[#allocation2 + $0x98] sm:$0xff] %v931_v16 }
 0x19d   : > { %v968_v17 = vld [vmem:[#allocation2 + $0xb0] sm:$0xff]  ;;  %v969_v18 = vld [vmem:[#allocation2] sm:$0xff]  ;;  %v970_v21 = vld [vmem:[#allocation2 + $0xd8] sm:$0xff] }
 0x19e   : > { %v2470_v19 = vld [vmem:[#allocation8] ss:$0 sm:$0xff]  ;;  %v2472_v20 = vld [vmem:[#allocation9] ss:$0 sm:$0xff]  ;;  %v971_v22 = vld [vmem:[#allocation2 + $0x18] sm:$0xff] }
 0x19f   : > { %v972_v23 = vld [vmem:[#allocation2 + $0x50] sm:$0xff]  ;;  %v1004_v24 = vmul.f32 %v2470_v19, %v968_v17  ;;  %v1005_v25 = vmul.f32 %v2470_v19, %v969_v18  ;;  %v1006_v26 = vmul.f32 %v2470_v19, %v970_v21  ;;  %v1007_v27 = vmul.f32 %v2470_v19, %v971_v22  ;;  %v973_v28 = vld [vmem:[#allocation2 + $0x68] sm:$0xff]  ;;  %v976_v43 = vld [vmem:[#allocation2 + $0x80] sm:$0xff] }
 0x1a0   : > { %v974_v29 = vld [vmem:[#allocation2 + $0x30] sm:$0xff]  ;;  %v975_v30 = vld [vmem:[#allocation2 + $0x48] sm:$0xff]  ;;  %v1008_v31 = vmul.f32 %v2470_v19, %v972_v23  ;;  %v1009_v32 = vmul.f32 %v2470_v19, %v973_v28  ;;  %v979_v50 = vld [vmem:[#allocation2 + $0xb8] sm:$0xff]  ;;  %v1012_v59 = vmul.f32 %v2470_v19, %v976_v43 }
 0x1a1   : > { %v1010_v33 = vmul.f32 %v2470_v19, %v974_v29  ;;  %v1011_v34 = vmul.f32 %v2470_v19, %v975_v30  ;;  %v1040_v35 = vadd.f32 %v2472_v20, %v1004_v24  ;;  %v1041_v36 = vadd.f32 %v2472_v20, %v1005_v25  ;;  %v977_v44 = vld [vmem:[#allocation2 + $0x88] sm:$0xff]  ;;  %v980_v55 = vld [vmem:[#allocation2 + $0x60] sm:$0xff]  ;;  %v981_v56 = vld [vmem:[#allocation2 + $0xf0] sm:$0xff] }
 0x1a2   : > { %v1042_v37 = vadd.f32 %v2472_v20, %v1006_v26  ;;  %v1043_v38 = vadd.f32 %v2472_v20, %v1007_v27  ;;  %v1044_v39 = vadd.f32 %v2472_v20, %v1008_v31  ;;  %v1045_v40 = vadd.f32 %v2472_v20, %v1009_v32  ;;  %v978_v49 = vld [vmem:[#allocation2 + $0xe8] sm:$0xff]  ;;  %v983_v62 = vld [vmem:[#allocation2 + $0x78] sm:$0xff]  ;;  %v986_v23 = vld [vmem:[#allocation2 + $0x40] sm:$0xff] }
 0x1a3   : > { %v1046_v41 = vadd.f32 %v2472_v20, %v1010_v33  ;;  %v1047_v42 = vadd.f32 %v2472_v20, %v1011_v34  ;;  %v1072_v45 = vmax.f32 %v1040_v35, 0.0  ;;  %v1073_v46 = vmax.f32 %v1041_v36, 0.0  ;;  %v982_v61 = vld [vmem:[#allocation2 + $0x8] sm:$0xff]  ;;  %v984_v11 = vld [vmem:[#allocation2 + $0x38] sm:$0xff]  ;;  %v988_v29 = vld [vmem:[#allocation2 + $0xe0] sm:$0xff] }
 0x1a4   : > { %v1074_v47 = vmax.f32 %v1042_v37, 0.0  ;;  %v1075_v48 = vmax.f32 %v1043_v38, 0.0  ;;  %v1076_v51 = vmax.f32 %v1044_v39, 0.0  ;;  %v1077_v52 = vmax.f32 %v1045_v40, 0.0  ;;  %v985_v16 = vld [vmem:[#allocation2 + $0x58] sm:$0xff]  ;;  %v987_v24 = vld [vmem:[#allocation2 + $0xc8] sm:$0xff] }
 0x1a5   : > { %v1078_v53 = vmax.f32 %v1046_v41, 0.0  ;;  %v1079_v54 = vmax.f32 %v1047_v42, 0.0  ;;  %v1595_v57 = vpack.c.bf16 %v1073_v46, %v1072_v45  ;;  %v1013_v60 = vmul.f32 %v2470_v19, %v977_v44  ;;  %v989_v30 = vld [vmem:[#allocation2 + $0x90] sm:$0xff]  ;;  %v991_v40 = vld [vmem:[#allocation2 + $0xc0] sm:$0xff]  ;;  %v992_v45 = vld [vmem:[#allocation2 + $0xa8] sm:$0xff] }
 0x1a6   : > { %v1600_v58 = vpack.c.bf16 %v1075_v48, %v1074_v47  ;;  %v1605_v63 = vpack.c.bf16 %v1077_v52, %v1076_v51  ;;  %v1014_v1 = vmul.f32 %v2470_v19, %v978_v49  ;;  %v1015_v2 = vmul.f32 %v2470_v19, %v979_v50  ;;  %v990_v35 = vld [vmem:[#allocation2 + $0x70] sm:$0xff] }
 0x1a7   : > { %v1610_v0 = vpack.c.bf16 %v1079_v54, %v1078_v53  ;;  %1596 = vst [vmem:[%s2386_s30] sm:$0xff] %v1595_v57   ;;  %v1048_v3 = vadd.f32 %v2472_v20, %v1012_v59  ;;  %v1049_v4 = vadd.f32 %v2472_v20, %v1013_v60  ;;  %v1016_v5 = vmul.f32 %v2470_v19, %v980_v55  ;;  %v993_v54 = vld [vmem:[#allocation2 + $0xd0] sm:$0xff]  ;;  %v995_v60 = vld [vmem:[#allocation2 + $0x28] sm:$0xff] }
 0x1a8   : > { %v1017_v6 = vmul.f32 %v2470_v19, %v981_v56  ;;  %1672 = vst [vmem:[%s2386_s30 + $0x8] sm:$0xff] %v1600_v58   ;;  %v1050_v7 = vadd.f32 %v2472_v20, %v1014_v1  ;;  %v1051_v8 = vadd.f32 %v2472_v20, %v1015_v2  ;;  %v1018_v9 = vmul.f32 %v2470_v19, %v982_v61  ;;  %v994_v59 = vld [vmem:[#allocation2 + $0x10] sm:$0xff]  ;;  %v996_v1 = vld [vmem:[#allocation2 + $0xa0] sm:$0xff]  ;;  %v997_v2 = vld [vmem:[#allocation2 + $0xf8] sm:$0xff] }
 0x1a9   : > { %v1019_v10 = vmul.f32 %v2470_v19, %v983_v62  ;;  %1673 = vst [vmem:[%s2386_s30 + $0x10] sm:$0xff] %v1605_v63   ;;  %v1080_v12 = vmax.f32 %v1048_v3, 0.0  ;;  %v1081_v13 = vmax.f32 %v1049_v4, 0.0  ;;  %v1052_v14 = vadd.f32 %v2472_v20, %v1016_v5 }
 0x1aa   : > { %v1053_v15 = vadd.f32 %v2472_v20, %v1017_v6  ;;  %1674 = vst [vmem:[%s2386_s30 + $0x18] sm:$0xff] %v1610_v0   ;;  %v1082_v17 = vmax.f32 %v1050_v7, 0.0  ;;  %v1083_v18 = vmax.f32 %v1051_v8, 0.0  ;;  %v1054_v21 = vadd.f32 %v2472_v20, %v1018_v9  ;;  %v998_v7 = vld [vmem:[#allocation2 + $0x20] sm:$0xff] }
 0x1ab   : > { %v1055_v22 = vadd.f32 %v2472_v20, %v1019_v10  ;;  %v1615_v25 = vpack.c.bf16 %v1081_v13, %v1080_v12  ;;  %v1084_v26 = vmax.f32 %v1052_v14, 0.0  ;;  %v1020_v28 = vmul.f32 %v2470_v19, %v984_v11  ;;  %v999_v12 = vld [vmem:[#allocation2 + $0x98] sm:$0xff] }
 0x1ac   : > { %v1085_v27 = vmax.f32 %v1053_v15, 0.0  ;;  %v1620_v31 = vpack.c.bf16 %v1083_v18, %v1082_v17  ;;  %v1086_v32 = vmax.f32 %v1054_v21, 0.0  ;;  %v1021_v34 = vmul.f32 %v2470_v19, %v985_v16 }
 0x1ad   : > { %v1087_v33 = vmax.f32 %v1055_v22, 0.0  ;;  %1675 = vst [vmem:[%s2386_s30 + $0x20] sm:$0xff] %v1615_v25   ;;  %v1056_v37 = vadd.f32 %v2472_v20, %v1020_v28  ;;  %v1022_v38 = vmul.f32 %v2470_v19, %v986_v23  ;;  %v1023_v39 = vmul.f32 %v2470_v19, %v987_v24 }
 0x1ae   : > { %v1625_v36 = vpack.c.bf16 %v1085_v27, %v1084_v26  ;;  %1676 = vst [vmem:[%s2386_s30 + $0x28] sm:$0xff] %v1620_v31   ;;  %v1057_v42 = vadd.f32 %v2472_v20, %v1021_v34  ;;  %v1024_v43 = vmul.f32 %v2470_v19, %v988_v29  ;;  %v1025_v44 = vmul.f32 %v2470_v19, %v989_v30 }
 0x1af   : > { %v1630_v41 = vpack.c.bf16 %v1087_v33, %v1086_v32  ;;  %v1088_v46 = vmax.f32 %v1056_v37, 0.0  ;;  %v1058_v47 = vadd.f32 %v2472_v20, %v1022_v38  ;;  %v1059_v48 = vadd.f32 %v2472_v20, %v1023_v39 }
 0x1b0   : > { %1677 = vst [vmem:[%s2386_s30 + $0x30] sm:$0xff] %v1625_v36   ;;  %v1026_v49 = vmul.f32 %v2470_v19, %v990_v35  ;;  %v1089_v50 = vmax.f32 %v1057_v42, 0.0  ;;  %v1060_v51 = vadd.f32 %v2472_v20, %v1024_v43  ;;  %v1061_v52 = vadd.f32 %v2472_v20, %v1025_v44 }
 0x1b1   : > { %1678 = vst [vmem:[%s2386_s30 + $0x38] sm:$0xff] %v1630_v41   ;;  %v1027_v53 = vmul.f32 %v2470_v19, %v991_v40  ;;  %v1090_v55 = vmax.f32 %v1058_v47, 0.0  ;;  %v1091_v56 = vmax.f32 %v1059_v48, 0.0  ;;  %v1028_v58 = vmul.f32 %v2470_v19, %v992_v45 }
 0x1b2   : > { %v1062_v57 = vadd.f32 %v2472_v20, %v1026_v49  ;;  %v1635_v61 = vpack.c.bf16 %v1089_v50, %v1088_v46  ;;  %v1092_v62 = vmax.f32 %v1060_v51, 0.0  ;;  %v1093_v63 = vmax.f32 %v1061_v52, 0.0 }
 0x1b3   : > { %v1063_v0 = vadd.f32 %v2472_v20, %v1027_v53  ;;  %v1640_v3 = vpack.c.bf16 %v1091_v56, %v1090_v55  ;;  %v1029_v5 = vmul.f32 %v2470_v19, %v993_v54  ;;  %v1064_v6 = vadd.f32 %v2472_v20, %v1028_v58 }
 0x1b4   : > { %v1094_v4 = vmax.f32 %v1062_v57, 0.0  ;;  %1679 = vst [vmem:[%s2386_s30 + $0x40] sm:$0xff] %v1635_v61   ;;  %v1645_v8 = vpack.c.bf16 %v1093_v63, %v1092_v62  ;;  %v1030_v10 = vmul.f32 %v2470_v19, %v994_v59  ;;  %v1031_v11 = vmul.f32 %v2470_v19, %v995_v60 }
 0x1b5   : > { %v1095_v9 = vmax.f32 %v1063_v0, 0.0  ;;  %1680 = vst [vmem:[%s2386_s30 + $0x48] sm:$0xff] %v1640_v3   ;;  %v1065_v13 = vadd.f32 %v2472_v20, %v1029_v5  ;;  %v1096_v14 = vmax.f32 %v1064_v6, 0.0  ;;  %v1032_v15 = vmul.f32 %v2470_v19, %v996_v1 }
 0x1b6   : > { %v1033_v16 = vmul.f32 %v2470_v19, %v997_v2  ;;  %1681 = vst [vmem:[%s2386_s30 + $0x50] sm:$0xff] %v1645_v8   ;;  %v1066_v18 = vadd.f32 %v2472_v20, %v1030_v10  ;;  %v1067_v21 = vadd.f32 %v2472_v20, %v1031_v11  ;;  %v1034_v22 = vmul.f32 %v2470_v19, %v998_v7 }
 0x1b7   : > { %v1650_v17 = vpack.c.bf16 %v1095_v9, %v1094_v4  ;;  %v1097_v23 = vmax.f32 %v1065_v13, 0.0  ;;  %v1068_v24 = vadd.f32 %v2472_v20, %v1032_v15  ;;  %v1035_v26 = vmul.f32 %v2470_v19, %v999_v12 }
 0x1b8   : > { %v1069_v25 = vadd.f32 %v2472_v20, %v1033_v16  ;;  %v1098_v27 = vmax.f32 %v1066_v18, 0.0  ;;  %v1099_v28 = vmax.f32 %v1067_v21, 0.0  ;;  %v1070_v29 = vadd.f32 %v2472_v20, %v1034_v22 }
 0x1b9   : > { %1682 = vst [vmem:[%s2386_s30 + $0x58] sm:$0xff] %v1650_v17   ;;  %v1655_v30 = vpack.c.bf16 %v1097_v23, %v1096_v14  ;;  %v1100_v31 = vmax.f32 %v1068_v24, 0.0  ;;  %v1071_v33 = vadd.f32 %v2472_v20, %v1035_v26 }
 0x1ba   : > { %v1101_v32 = vmax.f32 %v1069_v25, 0.0  ;;  %v1660_v34 = vpack.c.bf16 %v1099_v28, %v1098_v27  ;;  %v1102_v35 = vmax.f32 %v1070_v29, 0.0 }
 0x1bb   : > { %1683 = vst [vmem:[%s2386_s30 + $0x60] sm:$0xff] %v1655_v30   ;;  %v1103_v37 = vmax.f32 %v1071_v33, 0.0 }
 0x1bc   : > { %v1665_v36 = vpack.c.bf16 %v1101_v32, %v1100_v31  ;;  %1684 = vst [vmem:[%s2386_s30 + $0x68] sm:$0xff] %v1660_v34  }
 0x1bd   : > { %v1670_v38 = vpack.c.bf16 %v1103_v37, %v1102_v35 }
 0x1be   : > { %1685 = vst [vmem:[%s2386_s30 + $0x70] sm:$0xff] %v1665_v36  }
 0x1bf   : > { %1686 = vst [vmem:[%s2386_s30 + $0x78] sm:$0xff] %v1670_v38  }
 0x1c0 PF: > { %s2663_s24 = sld [smem:[#allocation20_spill]]  ;;  %s1182_s15 = sshll.u32 %s2386_s30, 4  ;;  %s1183_s15 = int_to_ptr.vmem [resolvable:$true] %s1182_s15 }
 0x1c1   : > { %s2665_s18 = sld [smem:[#allocation31_spill]]  ;;  %s1169_s2 = scalar_lea.sflag [#allocation5], %s327_s6 }
 0x1c6   : > { %s1591_s7 = sshll.u32 %s2663_s24, 7 }
 0x1c7   : > { %s2666_s9 = smov %s2665_s18  ;;  %s1181_s10 = scalar_lea.hbm %s2665_s18, %s1591_s7 }
 0x1c8   : > { %s1184_s23 = sshll.u32 %s1181_s10, 4  ;;  %s2006_s8 = scalar_lea.hbm %s2666_s9, 512  ;;  %s1185_s23 = int_to_ptr.hbm [resolvable:$true] %s1184_s23 }
 0x1c9   : > { %s2000_s25 = sshra.s32 %s1185_s23, 4  ;;  %s2001_s25 = int_to_ptr.hbm [resolvable:$true] %s2000_s25 }
 0x1ca   : > { %s2002_s27 = scalar_lea.hbm %s2001_s25, 128  ;;  %p2007_p12 = scmp.lt.s32.totalorder %s2001_s25, %s2666_s9 }
 0x1cb   : > { %p2003_p5 = scmp.ne.s32.totalorder %s2001_s25, %s2002_s27  ;;  %p2008_p0 = scmp.lt.s32.totalorder %s2006_s8, %s2002_s27 }
 0x1cd   : > { %p2004_p13 = pnand %p2003_p5, %p2272_p9  ;;  %p2009_p4 = por %p2008_p0, %p2007_p12 }
 0x1cf   : > { %p2005_p7 = pneg %p2004_p13 }
 0x1d1   : > { %p2010_p6 = pnand %p2009_p4, %p2005_p7 }
 0x1d3   : > { %2013 = shalt.err (!%p2010_p6)
}
 0x1d4   : > { %s2154_s13 = smov 64   ;;  %s2155_s4 = smov 4  }
 0x1d5   : > { %1716 = dma.vmem_to_hbm [thread:$0]  (%p2272_p9), %s1183_s15, 2048, %s1185_s23, %s1169_s2, %s2154_s13, %s2154_s13, %s2155_s4  }
 0x1d6 PF: > { %s2667_s6 = sld [smem:[#allocation17_spill]]  ;;  %p1741_p10 = scmp.ge.s32.totalorder %s2144_s28, 2 }
 0x1d8   : > { %p1733_p8 = pnand %p1741_p10, %p2277_p11 }
 0x1da   : > { %p1734_p2 = pneg %p1733_p8 }
 0x1dc   : > { %s1199_s30 = sand.u32 1, %s2667_s6  }
 0x1dd   : > { %s1200_s24 = scalar_lea.sflag [#allocation5], %s1199_s30 }
 0x1de   : > { %2087 = dma.done.wait (%p1734_p2), %s1200_s24, 2048  }
 0x1df   : > { %2089 = vsyncadd (%p1734_p2), %s1200_s24, 4294965248  ;;  %s24_s28 = sadd.s32 1, %s2144_s28   ;;  %s2670_s29 = sld [smem:[#allocation18_spill]] }
 0x1e0   : > { %p2576_p3 = scmp.ge.s32.totalorder %s24_s28, 14   ;;  %s2671_s3 = sld [smem:[#allocation26_spill]] }
 0x1e1   : > { %s2672_s14 = smov %s2347_s17  ;;  %s2673_s10 = sld [smem:[#allocation19_spill]] }
 0x1e2   : > { %s2674_s23 = sld [smem:[#allocation27_spill]]  ;;  %s2678_s15 = smov %s2096_s16 }
 0x1e3   : > { %s2675_s25 = sld [smem:[#allocation21_spill]]  ;;  %s2681_s18 = smov %s2108_s19 }
 0x1e4   : > { %s2676_s2 = sld [smem:[#allocation24_spill]]  ;;  %s2682_s19 = smov %s2112_s20 }
 0x1e5   : > { %s2677_s27 = sld [smem:[#allocation25_spill]]  ;;  %s2679_s16 = smov %s2670_s29 }
 0x1e6   : > { %s2680_s17 = smov %s2671_s3  ;;  %s2683_s20 = smov %s2672_s14 }
 0x1e7   : > { %s2684_s21 = smov %s2120_s22  ;;  %s2685_s22 = smov %s2673_s10 }
 0x1e8   : > { %s2686_s24 = smov %s2136_s26  ;;  %23 = sbr.rel (!%p2576_p3) target bundleno = 18 (0x12), region = 112 }
 0x1ea   : > { %s2687_s26 = smov %s2676_s2 }
 0x1ed   :  { %1206 = vsyncpa [#allocation4], 1 }
 0x1ee   :  { %1208 = vsyncpa [#allocation4 + $0x1], 1 }
 0x1ef   :  { %1209 = vsyncpa [#allocation7], 1 }
 0x1f0   :  { %1211 = vsyncpa [#allocation7 + $0x1], 1 }
 0x1f1   :  { %1212 = vsyncpa [#allocation10], 1 }
 0x1f2   :  { %1213 = vsyncpa [#allocation5], 1 }
 0x1f3   :  { %1215 = vsyncpa [#allocation5 + $0x1], 1 }

</bundles_post_ra>
